<compile_context>
chip_gen: v5e
topology: v5e:2x2
jax: 0.10.0
libtpu: 0.0.40
codegen_flags: <defaults>
</compile_context>

<pallas_src>
import jax
import jax.numpy as jnp
from jax.experimental import pallas as pl
from jax.experimental.pallas import tpu as pltpu


def _stride_conv_kernel(x_ref, w_ref, b_ref, o_ref):
    # x_ref: (4, Cin, Lt)   w_ref: (4, C4, Cin)   b_ref: (4, C4, 1)
    # o_ref: (4, C4, Lt)    -- block of the final (N, 4, C4, Ho*Wo) output
    for b in range(4):  # static Python unroll over the four branches
        acc = jnp.dot(w_ref[b], x_ref[b], preferred_element_type=jnp.float32)
        acc = acc + b_ref[b].astype(jnp.float32)
        o_ref[b] = acc.astype(o_ref.dtype)


# (row, col) shift of the view fed to op1..op4, matching the PyTorch forward.
_BRANCH_OFFSETS = ((0, 0), (1, 0), (0, 1), (1, 1))


def _branch_input(x, dr, dc):
    """Spatial sampling of Conv2d(k=1, stride=2, padding=1) applied to x[:, :, dr:, dc:]."""
    v = x[:, :, dr:, dc:]
    v = jnp.pad(v, ((0, 0), (0, 0), (1, 1), (1, 1)))
    return v[:, :, ::2, ::2]


def stride_conv2d(x, weights, biases):
    """Pallas forward of StrideConv2d.

    x:       (N, Cin, H, W)  with even H, W (so the four branches agree in size)
    weights: (4, Cout//4, Cin)   -- squeezed 1x1 conv weights of op1..op4
    biases:  (4, Cout//4)
    returns: (N, Cout, H//2 + 1, W//2 + 1)
    """
    n, cin, h, w = x.shape
    assert h % 2 == 0 and w % 2 == 0, "even H, W required so the 4 branches match"
    nb, c4, cin_w = weights.shape
    assert nb == 4 and cin_w == cin

    # (4, N, Cin, Ho, Wo) -> (4, N, Cin, L): no transpose, only a free reshape of
    # the trailing spatial dims.  XLA fuses the four pad/strided-slice producers
    # into the single stack write.
    sels = [_branch_input(x, dr, dc) for dr, dc in _BRANCH_OFFSETS]
    ho, wo = sels[0].shape[2], sels[0].shape[3]
    L = ho * wo
    xs = jnp.stack(sels, axis=0).reshape(4, n, cin, L)

    b2 = biases.reshape(4, c4, 1)
    itemsize = jnp.dtype(x.dtype).itemsize

    # Lane-tile sizing.  All four branches share one grid step, so per-step tile
    # data is 4*(Cin + C4)*lane_tile*itemsize.  A 3 MiB budget keeps the
    # double-buffered footprint well under v5e's 16 MiB default scoped VMEM and
    # v7x's 64 MiB physical VMEM; the 2048 cap keeps enough grid steps for
    # v7x's two TensorCores even when L is large.
    budget = 3 * 1024 * 1024
    per_col = max(4 * (cin + c4) * itemsize, 1)
    cap = max(128, min(2048, (budget // per_col) // 128 * 128))
    if L <= cap:
        lane_tile = L          # full extent: allowed, no padding needed
    else:
        lane_tile = cap        # boundary block (if any) is masked by Pallas
    l_tiles = pl.cdiv(L, lane_tile)

    flops = 2 * (4 * c4) * cin * n * L
    bytes_accessed = (4 * n * cin * L + n * 4 * c4 * L + 4 * c4 * (cin + 1)) * itemsize

    out = pl.pallas_call(
        _stride_conv_kernel,
        out_shape=jax.ShapeDtypeStruct((n, 4, c4, L), x.dtype),
        grid_spec=pltpu.PrefetchScalarGridSpec(
            num_scalar_prefetch=0,
            grid=(n, l_tiles),
            in_specs=[
                # xs: (4, N, Cin, L) -> kernel block (4, Cin, lane_tile)
                pl.BlockSpec(
                    (4, pl.Squeezed(), cin, lane_tile), lambda i, l: (0, i, 0, l)
                ),
                # weights: (4, C4, Cin), resident across the whole grid
                pl.BlockSpec((4, c4, cin), lambda i, l: (0, 0, 0)),
                # biases: (4, C4, 1)
                pl.BlockSpec((4, c4, 1), lambda i, l: (0, 0, 0)),
            ],
            # output written directly in final layout (N, 4, C4, L)
            out_specs=pl.BlockSpec(
                (pl.Squeezed(), 4, c4, lane_tile), lambda i, l: (i, 0, 0, l)
            ),
        ),
        compiler_params=pltpu.CompilerParams(
            dimension_semantics=("parallel", "parallel"),
        ),
        cost_estimate=pl.CostEstimate(
            flops=flops, transcendentals=0, bytes_accessed=bytes_accessed
        ),
    )(xs, weights, b2)

    # Free reshape: branch-major channel order matches torch.cat([op1..op4], dim=1).
    return out.reshape(n, 4 * c4, ho, wo)


def _reference(x, weights, biases):
    """Pure-XLA reference matching the PyTorch forward."""
    outs = []
    for b, (dr, dc) in enumerate(_BRANCH_OFFSETS):
        v = x[:, :, dr:, dc:]
        w4 = weights[b][:, :, None, None]  # (C4, Cin, 1, 1)
        o = jax.lax.conv_general_dilated(
            v,
            w4,
            window_strides=(2, 2),
            padding=((1, 1), (1, 1)),
            dimension_numbers=("NCHW", "OIHW", "NCHW"),
        )
        outs.append(o + biases[b][None, :, None, None])
    return jnp.concatenate(outs, axis=1)


if __name__ == "__main__":
    key = jax.random.PRNGKey(0)
    kx, kw, kb = jax.random.split(key, 3)

    N, Cin, H, W = 2, 4, 16, 16
    Cout = 8  # divisible by 4 -> each branch has Cout // 4 = 2 channels

    x = jax.random.normal(kx, (N, Cin, H, W), dtype=jnp.float32)
    weights = 0.1 * jax.random.normal(kw, (4, Cout // 4, Cin), dtype=jnp.float32)
    biases = 0.1 * jax.random.normal(kb, (4, Cout // 4), dtype=jnp.float32)

    y = jax.jit(stride_conv2d)(x, weights, biases)
    jax.block_until_ready(y)

    y_ref = _reference(x, weights, biases)
    assert y.shape == y_ref.shape == (N, Cout, H // 2 + 1, W // 2 + 1), (
        y.shape,
        y_ref.shape,
    )
    assert jnp.allclose(y, y_ref, atol=1e-5, rtol=1e-5)

    print("KERNEL_OK")
</pallas_src>

<mosaic_0001>
module attributes {stable_mosaic.version = 11 : i64} {
  func.func @_stride_conv_kernel(%arg0: i32, %arg1: i32, %arg2: memref<4x1x4x81xf32, #tpu.memory_space<vmem>>, %arg3: memref<4x2x4xf32, #tpu.memory_space<vmem>>, %arg4: memref<4x2x1xf32, #tpu.memory_space<vmem>>, %arg5: memref<1x4x2x81xf32, #tpu.memory_space<vmem>>) attributes {dimension_semantics = [#tpu.dimension_semantics<parallel>, #tpu.dimension_semantics<parallel>], iteration_bounds = array<i64: 2, 1>, scalar_prefetch = 0 : i64, scratch_operands = 0 : i64, tpu.core_type = #tpu.core_type<tc>, window_params = [{transform_indices = @transform_0, window_bounds = array<i64: 4, 1, 4, 81>}, {pipeline_mode = #tpu.pipeline_mode<synchronous>, transform_indices = @transform_1, window_bounds = array<i64: 4, 2, 4>}, {pipeline_mode = #tpu.pipeline_mode<synchronous>, transform_indices = @transform_2, window_bounds = array<i64: 4, 2, 1>}, {transform_indices = @transform_3, window_bounds = array<i64: 1, 4, 2, 81>}]} {
    %c0 = arith.constant 0 : index
    %c0_0 = arith.constant 0 : index
    %c0_1 = arith.constant 0 : index
    %0 = vector.load %arg3[%c0, %c0_0, %c0_1] : memref<4x2x4xf32, #tpu.memory_space<vmem>>, vector<1x2x4xf32>
    %1 = vector.shape_cast %0 : vector<1x2x4xf32> to vector<2x4xf32>
    %c0_2 = arith.constant 0 : index
    %c0_3 = arith.constant 0 : index
    %c0_4 = arith.constant 0 : index
    %c0_5 = arith.constant 0 : index
    %2 = vector.load %arg2[%c0_2, %c0_3, %c0_4, %c0_5] : memref<4x1x4x81xf32, #tpu.memory_space<vmem>>, vector<1x1x4x81xf32>
    %3 = vector.shape_cast %2 : vector<1x1x4x81xf32> to vector<4x81xf32>
    %cst = arith.constant dense<0.000000e+00> : vector<2x81xf32>
    %4 = tpu.matmul %1, %3, %cst {dimension_numbers = #tpu.dot_dimension_numbers<[1], [0], [0], [1], [0, 0, 1, 1], [], []>} : vector<2x4xf32>, vector<4x81xf32>, vector<2x81xf32> -> vector<2x81xf32>
    %c0_6 = arith.constant 0 : index
    %c0_7 = arith.constant 0 : index
    %c0_8 = arith.constant 0 : index
    %5 = vector.load %arg4[%c0_6, %c0_7, %c0_8] : memref<4x2x1xf32, #tpu.memory_space<vmem>>, vector<1x2x1xf32>
    %6 = vector.shape_cast %5 : vector<1x2x1xf32> to vector<2x1xf32>
    %7 = vector.broadcast %6 : vector<2x1xf32> to vector<2x81xf32>
    %8 = arith.addf %4, %7 : vector<2x81xf32>
    %c0_9 = arith.constant 0 : index
    %c0_10 = arith.constant 0 : index
    %c0_11 = arith.constant 0 : index
    %c0_12 = arith.constant 0 : index
    %9 = vector.load %arg5[%c0_9, %c0_10, %c0_11, %c0_12] : memref<1x4x2x81xf32, #tpu.memory_space<vmem>>, vector<1x1x2x81xf32>
    %10 = vector.shape_cast %9 : vector<1x1x2x81xf32> to vector<2x81xf32>
    %11 = vector.shape_cast %8 : vector<2x81xf32> to vector<1x1x2x81xf32>
    tpu.vector_store %arg5[%c0_9, %c0_10, %c0_11, %c0_12], %11 {strides = array<i32>} : memref<1x4x2x81xf32, #tpu.memory_space<vmem>>, vector<1x1x2x81xf32>,
    %c1 = arith.constant 1 : index
    %c0_13 = arith.constant 0 : index
    %c0_14 = arith.constant 0 : index
    %12 = vector.load %arg3[%c1, %c0_13, %c0_14] : memref<4x2x4xf32, #tpu.memory_space<vmem>>, vector<1x2x4xf32>
    %13 = vector.shape_cast %12 : vector<1x2x4xf32> to vector<2x4xf32>
    %c1_15 = arith.constant 1 : index
    %c0_16 = arith.constant 0 : index
    %c0_17 = arith.constant 0 : index
    %c0_18 = arith.constant 0 : index
    %14 = vector.load %arg2[%c1_15, %c0_16, %c0_17, %c0_18] : memref<4x1x4x81xf32, #tpu.memory_space<vmem>>, vector<1x1x4x81xf32>
    %15 = vector.shape_cast %14 : vector<1x1x4x81xf32> to vector<4x81xf32>
    %cst_19 = arith.constant dense<0.000000e+00> : vector<2x81xf32>
    %16 = tpu.matmul %13, %15, %cst_19 {dimension_numbers = #tpu.dot_dimension_numbers<[1], [0], [0], [1], [0, 0, 1, 1], [], []>} : vector<2x4xf32>, vector<4x81xf32>, vector<2x81xf32> -> vector<2x81xf32>
    %c1_20 = arith.constant 1 : index
    %c0_21 = arith.constant 0 : index
    %c0_22 = arith.constant 0 : index
    %17 = vector.load %arg4[%c1_20, %c0_21, %c0_22] : memref<4x2x1xf32, #tpu.memory_space<vmem>>, vector<1x2x1xf32>
    %18 = vector.shape_cast %17 : vector<1x2x1xf32> to vector<2x1xf32>
    %19 = vector.broadcast %18 : vector<2x1xf32> to vector<2x81xf32>
    %20 = arith.addf %16, %19 : vector<2x81xf32>
    %c0_23 = arith.constant 0 : index
    %c1_24 = arith.constant 1 : index
    %c0_25 = arith.constant 0 : index
    %c0_26 = arith.constant 0 : index
    %21 = vector.load %arg5[%c0_23, %c1_24, %c0_25, %c0_26] : memref<1x4x2x81xf32, #tpu.memory_space<vmem>>, vector<1x1x2x81xf32>
    %22 = vector.shape_cast %21 : vector<1x1x2x81xf32> to vector<2x81xf32>
    %23 = vector.shape_cast %20 : vector<2x81xf32> to vector<1x1x2x81xf32>
    tpu.vector_store %arg5[%c0_23, %c1_24, %c0_25, %c0_26], %23 {strides = array<i32>} : memref<1x4x2x81xf32, #tpu.memory_space<vmem>>, vector<1x1x2x81xf32>,
    %c2 = arith.constant 2 : index
    %c0_27 = arith.constant 0 : index
    %c0_28 = arith.constant 0 : index
    %24 = vector.load %arg3[%c2, %c0_27, %c0_28] : memref<4x2x4xf32, #tpu.memory_space<vmem>>, vector<1x2x4xf32>
    %25 = vector.shape_cast %24 : vector<1x2x4xf32> to vector<2x4xf32>
    %c2_29 = arith.constant 2 : index
    %c0_30 = arith.constant 0 : index
    %c0_31 = arith.constant 0 : index
    %c0_32 = arith.constant 0 : index
    %26 = vector.load %arg2[%c2_29, %c0_30, %c0_31, %c0_32] : memref<4x1x4x81xf32, #tpu.memory_space<vmem>>, vector<1x1x4x81xf32>
    %27 = vector.shape_cast %26 : vector<1x1x4x81xf32> to vector<4x81xf32>
    %cst_33 = arith.constant dense<0.000000e+00> : vector<2x81xf32>
    %28 = tpu.matmul %25, %27, %cst_33 {dimension_numbers = #tpu.dot_dimension_numbers<[1], [0], [0], [1], [0, 0, 1, 1], [], []>} : vector<2x4xf32>, vector<4x81xf32>, vector<2x81xf32> -> vector<2x81xf32>
    %c2_34 = arith.constant 2 : index
    %c0_35 = arith.constant 0 : index
    %c0_36 = arith.constant 0 : index
    %29 = vector.load %arg4[%c2_34, %c0_35, %c0_36] : memref<4x2x1xf32, #tpu.memory_space<vmem>>, vector<1x2x1xf32>
    %30 = vector.shape_cast %29 : vector<1x2x1xf32> to vector<2x1xf32>
    %31 = vector.broadcast %30 : vector<2x1xf32> to vector<2x81xf32>
    %32 = arith.addf %28, %31 : vector<2x81xf32>
    %c0_37 = arith.constant 0 : index
    %c2_38 = arith.constant 2 : index
    %c0_39 = arith.constant 0 : index
    %c0_40 = arith.constant 0 : index
    %33 = vector.load %arg5[%c0_37, %c2_38, %c0_39, %c0_40] : memref<1x4x2x81xf32, #tpu.memory_space<vmem>>, vector<1x1x2x81xf32>
    %34 = vector.shape_cast %33 : vector<1x1x2x81xf32> to vector<2x81xf32>
    %35 = vector.shape_cast %32 : vector<2x81xf32> to vector<1x1x2x81xf32>
    tpu.vector_store %arg5[%c0_37, %c2_38, %c0_39, %c0_40], %35 {strides = array<i32>} : memref<1x4x2x81xf32, #tpu.memory_space<vmem>>, vector<1x1x2x81xf32>,
    %c3 = arith.constant 3 : index
    %c0_41 = arith.constant 0 : index
    %c0_42 = arith.constant 0 : index
    %36 = vector.load %arg3[%c3, %c0_41, %c0_42] : memref<4x2x4xf32, #tpu.memory_space<vmem>>, vector<1x2x4xf32>
    %37 = vector.shape_cast %36 : vector<1x2x4xf32> to vector<2x4xf32>
    %c3_43 = arith.constant 3 : index
    %c0_44 = arith.constant 0 : index
    %c0_45 = arith.constant 0 : index
    %c0_46 = arith.constant 0 : index
    %38 = vector.load %arg2[%c3_43, %c0_44, %c0_45, %c0_46] : memref<4x1x4x81xf32, #tpu.memory_space<vmem>>, vector<1x1x4x81xf32>
    %39 = vector.shape_cast %38 : vector<1x1x4x81xf32> to vector<4x81xf32>
    %cst_47 = arith.constant dense<0.000000e+00> : vector<2x81xf32>
    %40 = tpu.matmul %37, %39, %cst_47 {dimension_numbers = #tpu.dot_dimension_numbers<[1], [0], [0], [1], [0, 0, 1, 1], [], []>} : vector<2x4xf32>, vector<4x81xf32>, vector<2x81xf32> -> vector<2x81xf32>
    %c3_48 = arith.constant 3 : index
    %c0_49 = arith.constant 0 : index
    %c0_50 = arith.constant 0 : index
    %41 = vector.load %arg4[%c3_48, %c0_49, %c0_50] : memref<4x2x1xf32, #tpu.memory_space<vmem>>, vector<1x2x1xf32>
    %42 = vector.shape_cast %41 : vector<1x2x1xf32> to vector<2x1xf32>
    %43 = vector.broadcast %42 : vector<2x1xf32> to vector<2x81xf32>
    %44 = arith.addf %40, %43 : vector<2x81xf32>
    %c0_51 = arith.constant 0 : index
    %c3_52 = arith.constant 3 : index
    %c0_53 = arith.constant 0 : index
    %c0_54 = arith.constant 0 : index
    %45 = vector.load %arg5[%c0_51, %c3_52, %c0_53, %c0_54] : memref<1x4x2x81xf32, #tpu.memory_space<vmem>>, vector<1x1x2x81xf32>
    %46 = vector.shape_cast %45 : vector<1x1x2x81xf32> to vector<2x81xf32>
    %47 = vector.shape_cast %44 : vector<2x81xf32> to vector<1x1x2x81xf32>
    tpu.vector_store %arg5[%c0_51, %c3_52, %c0_53, %c0_54], %47 {strides = array<i32>} : memref<1x4x2x81xf32, #tpu.memory_space<vmem>>, vector<1x1x2x81xf32>,
    return
  }
  func.func @transform_0(%arg0: i32, %arg1: i32) -> (i32, i32, i32, i32) {
    %c0_i32 = arith.constant 0 : i32
    %c0_i32_0 = arith.constant 0 : i32
    %c0_i32_1 = arith.constant 0 : i32
    return %c0_i32, %arg0, %c0_i32_0, %arg1 : i32, i32, i32, i32
  }
  func.func @transform_1(%arg0: i32, %arg1: i32) -> (i32, i32, i32) {
    %c0_i32 = arith.constant 0 : i32
    %c0_i32_0 = arith.constant 0 : i32
    %c0_i32_1 = arith.constant 0 : i32
    %c0_i32_2 = arith.constant 0 : i32
    return %c0_i32, %c0_i32_0, %c0_i32_1 : i32, i32, i32
  }
  func.func @transform_2(%arg0: i32, %arg1: i32) -> (i32, i32, i32) {
    %c0_i32 = arith.constant 0 : i32
    %c0_i32_0 = arith.constant 0 : i32
    %c0_i32_1 = arith.constant 0 : i32
    %c0_i32_2 = arith.constant 0 : i32
    return %c0_i32, %c0_i32_0, %c0_i32_1 : i32, i32, i32
  }
  func.func @transform_3(%arg0: i32, %arg1: i32) -> (i32, i32, i32, i32) {
    %c0_i32 = arith.constant 0 : i32
    %c0_i32_0 = arith.constant 0 : i32
    %c0_i32_1 = arith.constant 0 : i32
    return %arg0, %c0_i32, %c0_i32_0, %arg1 : i32, i32, i32, i32
  }
}

</mosaic_0001>

<bundles_post_ra>
// kernel: stride_conv2d.1
= control target key start
LH: loop header
LB: loop body
LE: loop exit
PB: predicated region body
PF: predicated region fallthrough
CT: control target
= control target key end

     0   :  { %s625_s12 = smov 0   ;;  %s627_s13 = smov 0   ;;  %s723_s0 = inlined_call_operand.vmem [shape: f32[4,2,4,81], index: 0, kind: input, shape index: {}]   ;;  %s724_s1 = inlined_call_operand.vmem [shape: f32[4,2,4], index: 1, kind: input, shape index: {}]   ;;  %s725_s2 = inlined_call_operand.vmem [shape: f32[4,2,1], index: 2, kind: input, shape index: {}]   ;;  %s726_s3 = inlined_call_operand.vmem [shape: f32[2,4,2,81], index: 3, kind: output, shape index: {}]  }
   0x1   :  { %s629_s14 = smov 0   ;;  %s631_s15 = smov 0  }
   0x2   :  { %s633_s16 = smov 0  }
   0x3 LB: > { %s25_s17 = sadd.s32 1, %s598_s15  ;;  %p41_p1 = scmp.ne.s32.totalorder %s590_s13, %s586_s12  ;;  %s602_s16 = sphi %s633_s16, %s13_s16   ;;  %s598_s15 = sphi %s631_s15, %s730_s15   ;;  %s594_s14 = sphi %s629_s14, %s729_s14   ;;  %s590_s13 = sphi %s627_s13, %s728_s13   ;;  %s586_s12 = sphi %s625_s12, %s727_s12  }
   0x4   : > { %p27_p0 = scmp.ge.s32.totalorder %s25_s17, 2  ;;  %p42_p2 = scmp.eq.s32.totalorder %s602_s16, 0 }
   0x5   : > { %s34_s19 = sadd.s32 1, %s590_s13  ;;  %p491_p5 = scmp.ge.s32.totalorder %s602_s16, 2 }
   0x6   : > { %s732_s17 = smov (%p27_p0, %s25_s17), 0  ;;  %p43_p3 = por %p42_p2, %p41_p1 }
   0x7   : > { %s29_s18 = ssub.s32 %s598_s15, %s732_s17  ;;  %143 = sbr.rel (%p491_p5) target bundleno = 20 (0x14), region = 24 }
   0x8   : > { %p32_p4 = scmp.eq.s32.totalorder %s29_s18, 0 }
   0xa   : > { %s660_s20 = scalar_select %p32_p4, %s590_s13, %s34_s19  }
   0xc   : > { %146 = sbr.rel (!%p43_p3) target bundleno = 20 (0x14), region = 28  ;;  %s148_s21 = sand.u32 (%p43_p3), 1, %s590_s13  }
   0xd   : > { %s493_s22 = sshll.u32 (%p43_p3), %s598_s15, 2  ;;  %s492_s23 = sshll.u32 (%p43_p3), %s148_s21, 4 }
   0xe   : > { %s153_s26 = scalar_lea.vmem (%p43_p3), %s723_s0, %s493_s22  ;;  %s150_s27 = scalar_lea.vmem (%p43_p3), [#allocation2], %s492_s23 }
   0xf   : > { %v170_v0 = vld [vmem:[%s153_s26] sm:$0xf] (%p43_p3)  ;;  %v172_v1 = vld [vmem:[%s153_s26 + $0x8] sm:$0xf] (%p43_p3)  ;;  %v174_v2 = vld [vmem:[%s153_s26 + $0x10] sm:$0xf] (%p43_p3) }
  0x10   : > { %171 = vst [vmem:[%s150_s27] sm:$0xf] (%p43_p3), %v170_v0  ;;  %v176_v3 = vld [vmem:[%s153_s26 + $0x18] sm:$0xf] (%p43_p3) }
  0x11   : > { %173 = vst [vmem:[%s150_s27 + $0x4] sm:$0xf] %v172_v1 }
  0x12   : > { %175 = vst [vmem:[%s150_s27 + $0x8] sm:$0xf] %v174_v2 }
  0x13   : > { %177 = vst [vmem:[%s150_s27 + $0xc] sm:$0xf] %v176_v3 }
  0x14 PF: > { %p494_p6 = scmp.ge.s32.totalorder %s602_s16, 1  ;;  %p208_p7 = scmp.lt.s32.totalorder %s602_s16, 3 }
  0x16   : > { %p209_p8 = pnand %p494_p6, %p208_p7 }
  0x17   : > { %s215_s28 = sand.u32 (!%p209_p8), 1, %s586_s12   ;;  %p241_p9 = scmp.lt.s32.totalorder (!%p209_p8), %s594_s14, 1 }
  0x18   : > { %212 = sbr.rel (%p209_p8) target bundleno = 170 (0xaa), region = 69  ;;  %s495_s29 = sshll.u32 (!%p209_p8), %s215_s28, 4 }
  0x19   : > { %s217_s9 = scalar_lea.vmem (!%p209_p8), [#allocation2], %s495_s29 }
  0x1d   : > { %vm261_vm0 = vcmask 1043456   ;;  %v604_v4 = vmov 0   ;;  %v249_v5 = vld [vmem:[%s724_s1] sm:$0x3]  ;;  %vm257_vm1 = vcmask 31744   ;;  %s734_s14 = smov (!%p241_p9, %s594_s14), 1 }
  0x1e   : > { %563 = vset.pattern.permute.xlu1 %v604_v4  ;;  %562 = vset.pattern.permute.xlu0 %v604_v4  ;;  %v500_v6 = vld [vmem:[%s724_s1 + $0x2] sm:$0x3]  ;;  %v508_v7 = vld [vmem:[%s725_s2 + $0x4] sm:$0x3]  ;;  %v507_v10 = vld [vmem:[%s217_s9 + $0x8] sm:$0xf] }
  0x1f   : > { %v250_v8 = vld [vmem:[%s217_s9] sm:$0xf]  ;;  %v501_v9 = vld [vmem:[%s217_s9 + $0x4] sm:$0xf]  ;;  %334 = vperm.xlu1 %563, %v508_v7   ;;  %v513_v11 = vld [vmem:[%s217_s9 + $0xc] sm:$0xf]  ;;  %509 = vmatpush.msk.msra.mxu2 %vm261_vm0, %v507_v10 }
  0x20   : > { %498 = vmatpush.msk.msra.mxu0 %vm261_vm0, %v250_v8  ;;  %503 = vmatpush.msk.msra.mxu1 %vm261_vm0, %v501_v9  ;;  %v506_v12 = vld [vmem:[%s724_s1 + $0x4] sm:$0x3]  ;;  %v512_v13 = vld [vmem:[%s724_s1 + $0x6] sm:$0x3]  ;;  %v251_v14 = vld [vmem:[%s725_s2] sm:$0x3] }
  0x21   : > { %515 = vmatpush.msk.msra.mxu3 %vm261_vm0, %v513_v11  ;;  %499 = vmatmul.msk.f32.vlgmr.msra.gmra.mxu0 %vm257_vm1, %v249_v5  ;;  %v514_v15 = vld [vmem:[%s725_s2 + $0x6] sm:$0x3]  ;;  %v502_v16 = vld [vmem:[%s725_s2 + $0x2] sm:$0x3]  ;;  %s520_s26 = sshll.u32 %s734_s14, 3  ;;  %vm285_vm2 = vcmask 656384  }
  0x22   : > { %504 = vmatmul.msk.f32.vlgmr.msra.gmra.mxu1 %vm257_vm1, %v500_v6  ;;  %510 = vmatmul.msk.f32.vlgmr.msra.gmra.mxu2 %vm257_vm1, %v506_v12  ;;  %s248_s29 = scalar_lea.vmem %s726_s3, %s520_s26 }
  0x23   : > { %516 = vmatmul.msk.f32.vlgmr.msra.gmra.mxu3 %vm257_vm1, %v512_v13  ;;  %254 = vperm.xlu0 %562, %v251_v14  }
  0x27   : > { %373 = vperm.xlu1 %563, %v514_v15  }
  0x2b   : > { %295 = vperm.xlu0 %562, %v502_v16  }
  0x91   : > { %v335_v18 = vpop.permute.xlu1 %334 }
  0x95   : > { %v255_v17 = vpop.permute.xlu0 %254 }
  0x99   : > { %v374_v24 = vpop.permute.xlu1 %373 }
  0x9d   : > { %v296_v19 = vpop.permute.xlu0 %295 }
  0x9e   : > { %v282_v20 = vpop.f32.mrf.mxu0 }
  0x9f   : > { %v321_v21 = vpop.f32.mrf.mxu1  ;;  %v283_v22 = vadd.f32 %v282_v20, %v255_v17 }
  0xa0   : > { %v322_v23 = vadd.f32 %v321_v21, %v296_v19 }
  0xa1   : > { %286 = vst.msk [vmem:[%s248_s29] sm:$0x3] %vm285_vm2, %v283_v22 }
  0xa2   : > { %505 = vst.msk [vmem:[%s248_s29 + $0x2] sm:$0x3] %vm285_vm2, %v322_v23 }
  0xa5   : > { %v360_v25 = vpop.f32.mrf.mxu2 }
  0xa6   : > { %v399_v26 = vpop.f32.mrf.mxu3  ;;  %v361_v27 = vadd.f32 %v360_v25, %v335_v18 }
  0xa7   : > { %v400_v28 = vadd.f32 %v399_v26, %v374_v24 }
  0xa8   : > { %511 = vst.msk [vmem:[%s248_s29 + $0x4] sm:$0x3] %vm285_vm2, %v361_v27 }
  0xa9   : > { %517 = vst.msk [vmem:[%s248_s29 + $0x6] sm:$0x3] %vm285_vm2, %v400_v28 }
  0xaa PF: > { %s13_s16 = sadd.s32 1, %s602_s16   ;;  %s727_s12 = smov %s590_s13 }
  0xab   : > { %p10_p10 = scmp.ge.s32.totalorder %s13_s16, 4   ;;  %s728_s13 = smov %s660_s20 }
  0xac   : > { %s729_s14 = smov %s598_s15  ;;  %s730_s15 = smov %s732_s17 }
  0xad   :  { %12 = sbr.rel (!%p10_p10) target bundleno = 3 (0x3), region = 120 }

</bundles_post_ra>
